<compile_context>
chip_gen: v7x
topology: tpu7x:2x2x1
jax: 0.10.0
libtpu: 0.0.40
codegen_flags: <defaults>
</compile_context>

<pallas_src>
import functools

import jax
import jax.numpy as jnp
from jax.experimental import pallas as pl
from jax.experimental.pallas import tpu as pltpu

KK = 105                 # hidden width of the PyTorch module
HP = 128                 # lane-aligned (padded) hidden width used in-kernel
OUTP = 128               # lane-dense fused output width (mean | log_std | zero pad)
LOG_STD_MAX = 2.0
LOG_STD_MIN = -5.0


def _round_up(n, m):
    return ((n + m - 1) // m) * m


def _flap_actor_kernel(task_ref,                    # scalar-prefetch (SMEM), used only in index_maps
                       x_ref,
                       w1_ref, b1_ref,
                       w2_ref, b2_ref,
                       w3_ref, b3_ref,
                       wh_ref, bh_ref,              # fused (mean|logstd) head for the selected task
                       out_ref,
                       *, act_dim):
    del task_ref  # head selection is done by the BlockSpec index_map

    # trunk: Linear -> ReLU, Linear -> ReLU, Linear -> ReLU (has_act_final=True)
    x = x_ref[...].astype(jnp.bfloat16)
    h = jnp.dot(x, w1_ref[...], preferred_element_type=jnp.float32) + b1_ref[...]
    h = jnp.maximum(h, 0.0)
    h = jnp.dot(h.astype(jnp.bfloat16), w2_ref[...],
                preferred_element_type=jnp.float32) + b2_ref[...]
    h = jnp.maximum(h, 0.0)
    feats = jnp.dot(h.astype(jnp.bfloat16), w3_ref[...],
                    preferred_element_type=jnp.float32) + b3_ref[...]
    feats = jnp.maximum(feats, 0.0)

    # single fused head matmul: lanes [0,A) = mean, [A,2A) = raw log_std, rest pad
    head = jnp.dot(feats.astype(jnp.bfloat16), wh_ref[...],
                   preferred_element_type=jnp.float32) + bh_ref[...]

    # tanh runs on the EUP slot (essentially free); select per-lane which
    # post-processing applies, then one lane-dense unmasked store.
    log_std = LOG_STD_MIN + 0.5 * (LOG_STD_MAX - LOG_STD_MIN) * (jnp.tanh(head) + 1.0)
    lane = jax.lax.broadcasted_iota(jnp.int32, head.shape, 1)
    out_ref[...] = jnp.where(lane < act_dim, head, log_std)


def init_params(key, obs_dim, act_dim, n_tasks, hidden=KK):
    """Unpadded f32 parameters, matching the PyTorch module's shapes ([in,out])."""
    ks = jax.random.split(key, 4 + n_tasks)

    def lin(k, fan_in, fan_out):
        bound = 1.0 / jnp.sqrt(fan_in)
        kw, kb = jax.random.split(k)
        w = jax.random.uniform(kw, (fan_in, fan_out), jnp.float32, -bound, bound)
        b = jax.random.uniform(kb, (1, fan_out), jnp.float32, -bound, bound)
        return w, b

    w1, b1 = lin(ks[0], obs_dim, hidden)
    w2, b2 = lin(ks[1], hidden, hidden)
    w3, b3 = lin(ks[2], hidden, hidden)
    wl, bl = lin(ks[3], hidden, act_dim)
    heads = [lin(ks[4 + t], hidden, act_dim) for t in range(n_tasks)]
    heads_w = jnp.stack([h[0] for h in heads])     # [n_tasks, hidden, act_dim]
    heads_b = jnp.stack([h[1] for h in heads])     # [n_tasks, 1, act_dim]
    return dict(w1=w1, b1=b1, w2=w2, b2=b2, w3=w3, b3=b3,
                wl=wl, bl=bl, heads_w=heads_w, heads_b=heads_b)


def prepare_params(params, hidden_pad=HP, out_pad=OUTP):
    """Pad to lane-aligned shapes, fuse (mean-head | fc_logstd) per task, cast weights to bf16."""
    obs_dim, H = params["w1"].shape
    A = params["wl"].shape[1]
    n_tasks = params["heads_w"].shape[0]
    assert 2 * A <= out_pad and H <= hidden_pad

    def pad2(a, shape):
        return jnp.pad(a, [(0, s - d) for d, s in zip(a.shape, shape)])

    w1 = pad2(params["w1"], (obs_dim, hidden_pad)).astype(jnp.bfloat16)
    w2 = pad2(params["w2"], (hidden_pad, hidden_pad)).astype(jnp.bfloat16)
    w3 = pad2(params["w3"], (hidden_pad, hidden_pad)).astype(jnp.bfloat16)
    b1 = pad2(params["b1"], (1, hidden_pad))
    b2 = pad2(params["b2"], (1, hidden_pad))
    b3 = pad2(params["b3"], (1, hidden_pad))

    heads_w = jnp.zeros((n_tasks, hidden_pad, out_pad), jnp.float32)
    heads_w = heads_w.at[:, :H, :A].set(params["heads_w"])
    heads_w = heads_w.at[:, :H, A:2 * A].set(
        jnp.broadcast_to(params["wl"], (n_tasks, H, A)))
    heads_b = jnp.zeros((n_tasks, 1, out_pad), jnp.float32)
    heads_b = heads_b.at[:, :, :A].set(params["heads_b"])
    heads_b = heads_b.at[:, :, A:2 * A].set(
        jnp.broadcast_to(params["bl"], (n_tasks, 1, A)))

    return dict(w1=w1, b1=b1, w2=w2, b2=b2, w3=w3, b3=b3,
                heads_w=heads_w.astype(jnp.bfloat16), heads_b=heads_b,
                act_dim=A, obs_dim=obs_dim)


def flap_actor_forward(x, prepped, task):
    """Forward pass of FLAPActor -> (mean, log_std)."""
    B, obs_dim = x.shape
    A = prepped["act_dim"]
    Hp = prepped["w1"].shape[1]
    Op = prepped["heads_w"].shape[-1]

    # Batch tiling: TB-row blocks (>=8 sublanes). Large batches split across
    # grid steps / v7x TensorCores; weights stay resident (constant index_map).
    TB = min(_round_up(B, 8), 256)
    Bp = _round_up(B, TB)
    if Bp != B:
        x = jnp.pad(x, ((0, Bp - B), (0, 0)))
    nb = pl.cdiv(Bp, TB)

    # TODO(synk): force_weights path would substitute a fused (ww|wl) block for
    # prepped["heads_w"]/["heads_b"] here; kernel is otherwise identical.
    task_arr = jnp.asarray([task], dtype=jnp.int32)

    kernel = functools.partial(_flap_actor_kernel, act_dim=A)

    out = pl.pallas_call(
        kernel,
        out_shape=jax.ShapeDtypeStruct((Bp, Op), jnp.float32),
        grid_spec=pltpu.PrefetchScalarGridSpec(
            num_scalar_prefetch=1,
            grid=(nb,),
            in_specs=[
                pl.BlockSpec((TB, obs_dim), lambda b, t: (b, 0)),        # x
                pl.BlockSpec((obs_dim, Hp), lambda b, t: (0, 0)),        # w1
                pl.BlockSpec((1, Hp),       lambda b, t: (0, 0)),        # b1
                pl.BlockSpec((Hp, Hp),      lambda b, t: (0, 0)),        # w2
                pl.BlockSpec((1, Hp),       lambda b, t: (0, 0)),        # b2
                pl.BlockSpec((Hp, Hp),      lambda b, t: (0, 0)),        # w3
                pl.BlockSpec((1, Hp),       lambda b, t: (0, 0)),        # b3
                pl.BlockSpec((None, Hp, Op), lambda b, t: (t[0], 0, 0)),  # fused head W (task-selected)
                pl.BlockSpec((None, 1, Op),  lambda b, t: (t[0], 0, 0)),  # fused head b (task-selected)
            ],
            out_specs=pl.BlockSpec((TB, Op), lambda b, t: (b, 0)),
        ),
        compiler_params=pltpu.CompilerParams(
            dimension_semantics=("parallel",)),
    )(task_arr, x,
      prepped["w1"], prepped["b1"],
      prepped["w2"], prepped["b2"],
      prepped["w3"], prepped["b3"],
      prepped["heads_w"], prepped["heads_b"])

    mean = out[:B, :A]
    log_std = out[:B, A:2 * A]
    return mean, log_std


def _reference_forward(x, params, task):
    relu = lambda v: jnp.maximum(v, 0.0)
    h = relu(x @ params["w1"] + params["b1"])
    h = relu(h @ params["w2"] + params["b2"])
    feats = relu(h @ params["w3"] + params["b3"])
    mean = feats @ params["heads_w"][task] + params["heads_b"][task]
    ls = jnp.tanh(feats @ params["wl"] + params["bl"])
    log_std = LOG_STD_MIN + 0.5 * (LOG_STD_MAX - LOG_STD_MIN) * (ls + 1.0)
    return mean, log_std


if __name__ == "__main__":
    key = jax.random.PRNGKey(0)
    k_param, k_x = jax.random.split(key)

    batch, obs_dim, act_dim, n_tasks = 8, 32, 8, 3
    task = 1

    params = init_params(k_param, obs_dim, act_dim, n_tasks, hidden=KK)
    prepped = prepare_params(params)
    x = jax.random.normal(k_x, (batch, obs_dim), jnp.float32)

    mean, log_std = flap_actor_forward(x, prepped, task)
    jax.block_until_ready((mean, log_std))

    ref_mean, ref_log_std = _reference_forward(x, params, task)
    # bf16 MXU inputs (f32 accumulation) -> loosened tolerance vs. f32 reference.
    assert jnp.allclose(mean, ref_mean, atol=5e-2, rtol=5e-2)
    assert jnp.allclose(log_std, ref_log_std, atol=5e-2, rtol=5e-2)
    assert mean.shape == (batch, act_dim) and log_std.shape == (batch, act_dim)
    assert jnp.all(log_std >= LOG_STD_MIN) and jnp.all(log_std <= LOG_STD_MAX)

    print("KERNEL_OK")
</pallas_src>

<mosaic_0001>
module attributes {stable_mosaic.version = 11 : i64} {
  func.func @_flap_actor_kernel(%arg0: i32, %arg1: memref<1xi32, #tpu.memory_space<smem>>, %arg2: memref<8x32xf32, #tpu.memory_space<vmem>>, %arg3: memref<32x128xbf16, #tpu.memory_space<vmem>>, %arg4: memref<1x128xf32, #tpu.memory_space<vmem>>, %arg5: memref<128x128xbf16, #tpu.memory_space<vmem>>, %arg6: memref<1x128xf32, #tpu.memory_space<vmem>>, %arg7: memref<128x128xbf16, #tpu.memory_space<vmem>>, %arg8: memref<1x128xf32, #tpu.memory_space<vmem>>, %arg9: memref<1x128x128xbf16, #tpu.memory_space<vmem>>, %arg10: memref<1x1x128xf32, #tpu.memory_space<vmem>>, %arg11: memref<8x128xf32, #tpu.memory_space<vmem>>) attributes {dimension_semantics = [#tpu.dimension_semantics<parallel>], iteration_bounds = array<i64: 1>, scalar_prefetch = 1 : i64, scratch_operands = 0 : i64, tpu.core_type = #tpu.core_type<tc>, window_params = [{transform_indices = @transform_0, window_bounds = array<i64: 8, 32>}, {pipeline_mode = #tpu.pipeline_mode<synchronous>, transform_indices = @transform_1, window_bounds = array<i64: 32, 128>}, {pipeline_mode = #tpu.pipeline_mode<synchronous>, transform_indices = @transform_2, window_bounds = array<i64: 1, 128>}, {pipeline_mode = #tpu.pipeline_mode<synchronous>, transform_indices = @transform_3, window_bounds = array<i64: 128, 128>}, {pipeline_mode = #tpu.pipeline_mode<synchronous>, transform_indices = @transform_4, window_bounds = array<i64: 1, 128>}, {pipeline_mode = #tpu.pipeline_mode<synchronous>, transform_indices = @transform_5, window_bounds = array<i64: 128, 128>}, {pipeline_mode = #tpu.pipeline_mode<synchronous>, transform_indices = @transform_6, window_bounds = array<i64: 1, 128>}, {transform_indices = @transform_7, window_bounds = array<i64: 1, 128, 128>}, {transform_indices = @transform_8, window_bounds = array<i64: 1, 1, 128>}, {transform_indices = @transform_9, window_bounds = array<i64: 8, 128>}]} {
    %c0 = arith.constant 0 : index
    %c0_0 = arith.constant 0 : index
    %0 = vector.load %arg2[%c0, %c0_0] : memref<8x32xf32, #tpu.memory_space<vmem>>, vector<8x32xf32>
    %1 = arith.truncf %0 : vector<8x32xf32> to vector<8x32xbf16>
    %c0_1 = arith.constant 0 : index
    %c0_2 = arith.constant 0 : index
    %2 = vector.load %arg3[%c0_1, %c0_2] : memref<32x128xbf16, #tpu.memory_space<vmem>>, vector<32x128xbf16>
    %cst = arith.constant dense<0.000000e+00> : vector<8x128xf32>
    %3 = tpu.matmul %1, %2, %cst {dimension_numbers = #tpu.dot_dimension_numbers<[1], [0], [0], [1], [0, 0, 1, 1], [], []>} : vector<8x32xbf16>, vector<32x128xbf16>, vector<8x128xf32> -> vector<8x128xf32>
    %c0_3 = arith.constant 0 : index
    %c0_4 = arith.constant 0 : index
    %4 = vector.load %arg4[%c0_3, %c0_4] : memref<1x128xf32, #tpu.memory_space<vmem>>, vector<1x128xf32>
    %5 = vector.broadcast %4 : vector<1x128xf32> to vector<8x128xf32>
    %6 = arith.addf %3, %5 : vector<8x128xf32>
    %cst_5 = arith.constant 0.000000e+00 : f32
    %7 = vector.broadcast %cst_5 : f32 to vector<8x128xf32>
    %8 = arith.maximumf %6, %7 : vector<8x128xf32>
    %9 = arith.truncf %8 : vector<8x128xf32> to vector<8x128xbf16>
    %c0_6 = arith.constant 0 : index
    %c0_7 = arith.constant 0 : index
    %10 = vector.load %arg5[%c0_6, %c0_7] : memref<128x128xbf16, #tpu.memory_space<vmem>>, vector<128x128xbf16>
    %cst_8 = arith.constant dense<0.000000e+00> : vector<8x128xf32>
    %11 = tpu.matmul %9, %10, %cst_8 {dimension_numbers = #tpu.dot_dimension_numbers<[1], [0], [0], [1], [0, 0, 1, 1], [], []>} : vector<8x128xbf16>, vector<128x128xbf16>, vector<8x128xf32> -> vector<8x128xf32>
    %c0_9 = arith.constant 0 : index
    %c0_10 = arith.constant 0 : index
    %12 = vector.load %arg6[%c0_9, %c0_10] : memref<1x128xf32, #tpu.memory_space<vmem>>, vector<1x128xf32>
    %13 = vector.broadcast %12 : vector<1x128xf32> to vector<8x128xf32>
    %14 = arith.addf %11, %13 : vector<8x128xf32>
    %cst_11 = arith.constant 0.000000e+00 : f32
    %15 = vector.broadcast %cst_11 : f32 to vector<8x128xf32>
    %16 = arith.maximumf %14, %15 : vector<8x128xf32>
    %17 = arith.truncf %16 : vector<8x128xf32> to vector<8x128xbf16>
    %c0_12 = arith.constant 0 : index
    %c0_13 = arith.constant 0 : index
    %18 = vector.load %arg7[%c0_12, %c0_13] : memref<128x128xbf16, #tpu.memory_space<vmem>>, vector<128x128xbf16>
    %cst_14 = arith.constant dense<0.000000e+00> : vector<8x128xf32>
    %19 = tpu.matmul %17, %18, %cst_14 {dimension_numbers = #tpu.dot_dimension_numbers<[1], [0], [0], [1], [0, 0, 1, 1], [], []>} : vector<8x128xbf16>, vector<128x128xbf16>, vector<8x128xf32> -> vector<8x128xf32>
    %c0_15 = arith.constant 0 : index
    %c0_16 = arith.constant 0 : index
    %20 = vector.load %arg8[%c0_15, %c0_16] : memref<1x128xf32, #tpu.memory_space<vmem>>, vector<1x128xf32>
    %21 = vector.broadcast %20 : vector<1x128xf32> to vector<8x128xf32>
    %22 = arith.addf %19, %21 : vector<8x128xf32>
    %cst_17 = arith.constant 0.000000e+00 : f32
    %23 = vector.broadcast %cst_17 : f32 to vector<8x128xf32>
    %24 = arith.maximumf %22, %23 : vector<8x128xf32>
    %25 = arith.truncf %24 : vector<8x128xf32> to vector<8x128xbf16>
    %c0_18 = arith.constant 0 : index
    %c0_19 = arith.constant 0 : index
    %c0_20 = arith.constant 0 : index
    %26 = vector.load %arg9[%c0_18, %c0_19, %c0_20] : memref<1x128x128xbf16, #tpu.memory_space<vmem>>, vector<1x128x128xbf16>
    %27 = vector.shape_cast %26 : vector<1x128x128xbf16> to vector<128x128xbf16>
    %cst_21 = arith.constant dense<0.000000e+00> : vector<8x128xf32>
    %28 = tpu.matmul %25, %27, %cst_21 {dimension_numbers = #tpu.dot_dimension_numbers<[1], [0], [0], [1], [0, 0, 1, 1], [], []>} : vector<8x128xbf16>, vector<128x128xbf16>, vector<8x128xf32> -> vector<8x128xf32>
    %c0_22 = arith.constant 0 : index
    %c0_23 = arith.constant 0 : index
    %c0_24 = arith.constant 0 : index
    %29 = vector.load %arg10[%c0_22, %c0_23, %c0_24] : memref<1x1x128xf32, #tpu.memory_space<vmem>>, vector<1x1x128xf32>
    %30 = vector.shape_cast %29 : vector<1x1x128xf32> to vector<1x128xf32>
    %31 = vector.broadcast %30 : vector<1x128xf32> to vector<8x128xf32>
    %32 = arith.addf %28, %31 : vector<8x128xf32>
    %33 = math.tanh %32 : vector<8x128xf32>
    %cst_25 = arith.constant 1.000000e+00 : f32
    %34 = vector.broadcast %cst_25 : f32 to vector<8x128xf32>
    %35 = arith.addf %33, %34 : vector<8x128xf32>
    %cst_26 = arith.constant 3.500000e+00 : f32
    %36 = vector.broadcast %cst_26 : f32 to vector<8x128xf32>
    %37 = arith.mulf %36, %35 : vector<8x128xf32>
    %cst_27 = arith.constant -5.000000e+00 : f32
    %38 = vector.broadcast %cst_27 : f32 to vector<8x128xf32>
    %39 = arith.addf %38, %37 : vector<8x128xf32>
    %40 = tpu.iota {dimensions = array<i32: 1>} : vector<8x128xi32>
    %c8_i32 = arith.constant 8 : i32
    %41 = vector.broadcast %c8_i32 : i32 to vector<8x128xi32>
    %42 = arith.cmpi slt, %40, %41 : vector<8x128xi32>
    %43 = arith.select %42, %32, %39 : vector<8x128xi1>, vector<8x128xf32>
    %c0_28 = arith.constant 0 : index
    %c0_29 = arith.constant 0 : index
    %44 = vector.load %arg11[%c0_28, %c0_29] : memref<8x128xf32, #tpu.memory_space<vmem>>, vector<8x128xf32>
    tpu.vector_store %arg11[%c0_28, %c0_29], %43 {strides = array<i32>} : memref<8x128xf32, #tpu.memory_space<vmem>>, vector<8x128xf32>,
    return
  }
  func.func @transform_0(%arg0: i32, %arg1: memref<1xi32, #tpu.memory_space<smem>>) -> (i32, i32) {
    %c0_i32 = arith.constant 0 : i32
    %c0_i32_0 = arith.constant 0 : i32
    return %arg0, %c0_i32 : i32, i32
  }
  func.func @transform_1(%arg0: i32, %arg1: memref<1xi32, #tpu.memory_space<smem>>) -> (i32, i32) {
    %c0_i32 = arith.constant 0 : i32
    %c0_i32_0 = arith.constant 0 : i32
    %c0_i32_1 = arith.constant 0 : i32
    return %c0_i32, %c0_i32_0 : i32, i32
  }
  func.func @transform_2(%arg0: i32, %arg1: memref<1xi32, #tpu.memory_space<smem>>) -> (i32, i32) {
    %c0_i32 = arith.constant 0 : i32
    %c0_i32_0 = arith.constant 0 : i32
    %c0_i32_1 = arith.constant 0 : i32
    return %c0_i32, %c0_i32_0 : i32, i32
  }
  func.func @transform_3(%arg0: i32, %arg1: memref<1xi32, #tpu.memory_space<smem>>) -> (i32, i32) {
    %c0_i32 = arith.constant 0 : i32
    %c0_i32_0 = arith.constant 0 : i32
    %c0_i32_1 = arith.constant 0 : i32
    return %c0_i32, %c0_i32_0 : i32, i32
  }
  func.func @transform_4(%arg0: i32, %arg1: memref<1xi32, #tpu.memory_space<smem>>) -> (i32, i32) {
    %c0_i32 = arith.constant 0 : i32
    %c0_i32_0 = arith.constant 0 : i32
    %c0_i32_1 = arith.constant 0 : i32
    return %c0_i32, %c0_i32_0 : i32, i32
  }
  func.func @transform_5(%arg0: i32, %arg1: memref<1xi32, #tpu.memory_space<smem>>) -> (i32, i32) {
    %c0_i32 = arith.constant 0 : i32
    %c0_i32_0 = arith.constant 0 : i32
    %c0_i32_1 = arith.constant 0 : i32
    return %c0_i32, %c0_i32_0 : i32, i32
  }
  func.func @transform_6(%arg0: i32, %arg1: memref<1xi32, #tpu.memory_space<smem>>) -> (i32, i32) {
    %c0_i32 = arith.constant 0 : i32
    %c0_i32_0 = arith.constant 0 : i32
    %c0_i32_1 = arith.constant 0 : i32
    return %c0_i32, %c0_i32_0 : i32, i32
  }
  func.func @transform_7(%arg0: i32, %arg1: memref<1xi32, #tpu.memory_space<smem>>) -> (i32, i32, i32) {
    %c0 = arith.constant 0 : index
    %0 = memref.load %arg1[%c0] : memref<1xi32, #tpu.memory_space<smem>>
    %c0_i32 = arith.constant 0 : i32
    %c0_i32_0 = arith.constant 0 : i32
    %c0_i32_1 = arith.constant 0 : i32
    return %0, %c0_i32, %c0_i32_0 : i32, i32, i32
  }
  func.func @transform_8(%arg0: i32, %arg1: memref<1xi32, #tpu.memory_space<smem>>) -> (i32, i32, i32) {
    %c0 = arith.constant 0 : index
    %0 = memref.load %arg1[%c0] : memref<1xi32, #tpu.memory_space<smem>>
    %c0_i32 = arith.constant 0 : i32
    %c0_i32_0 = arith.constant 0 : i32
    %c0_i32_1 = arith.constant 0 : i32
    return %0, %c0_i32, %c0_i32_0 : i32, i32, i32
  }
  func.func @transform_9(%arg0: i32, %arg1: memref<1xi32, #tpu.memory_space<smem>>) -> (i32, i32) {
    %c0_i32 = arith.constant 0 : i32
    %c0_i32_0 = arith.constant 0 : i32
    return %arg0, %c0_i32 : i32, i32
  }
}

</mosaic_0001>

<bundles_post_ra>
// kernel: tpu_custom_call.1
= control target key start
LH: loop header
LB: loop body
LE: loop exit
PB: predicated region body
PF: predicated region fallthrough
CT: control target
= control target key end

     0   :  { %16 = vsyncpa [#allocation5], 0  ;;  %s1073_s0 = inlined_call_operand.<no memory space> [shape: s32[1], index: 0, kind: input, shape index: {}]   ;;  %s1074_s1 = inlined_call_operand.hbm [shape: f32[8,32], index: 1, kind: input, shape index: {}]   ;;  %s1075_s2 = inlined_call_operand.hbm [shape: bf16[32,128], index: 2, kind: input, shape index: {}]   ;;  %s1076_s3 = inlined_call_operand.vmem [shape: f32[1,128], index: 3, kind: input, shape index: {}]   ;;  %s1077_s4 = inlined_call_operand.hbm [shape: bf16[128,128], index: 4, kind: input, shape index: {}]   ;;  %s1078_s5 = inlined_call_operand.vmem [shape: f32[1,128], index: 5, kind: input, shape index: {}]   ;;  %s1079_s6 = inlined_call_operand.hbm [shape: bf16[128,128], index: 6, kind: input, shape index: {}]   ;;  %s1080_s7 = inlined_call_operand.vmem [shape: f32[1,128], index: 7, kind: input, shape index: {}]   ;;  %s1081_s8 = inlined_call_operand.hbm [shape: bf16[3,128,128], index: 8, kind: input, shape index: {}]   ;;  %s1082_s9 = inlined_call_operand.vmem [shape: f32[3,1,128], index: 9, kind: input, shape index: {}]   ;;  %s1083_s10 = inlined_call_operand.hbm [shape: f32[8,128], index: 10, kind: output, shape index: {}]  }
   0x1   :  { %17 = vsyncpa [#allocation8], 0 }
   0x2   :  { %18 = vsyncpa [#allocation11], 0 }
   0x3   :  { %19 = vsyncpa [#allocation6], 0  ;;  %s872_s13 = smov [#allocation7]   ;;  %s730_s17 = scalar_lea.hbm %s1075_s2, 256 }
   0x4   :  { %s35_s14 = sshll.u32 %s872_s13, 4  ;;  %p731_p0 = scmp.ne.s32.totalorder %s1075_s2, %s730_s17  ;;  %s36_s14 = int_to_ptr.vmem [resolvable:$true] %s35_s14 }
   0x5   :  { %p734_p1 = scmp.lt.u32.totalorder %s730_s17, %s1075_s2 }
   0x7   :  { %p736_p2 = pnand %p734_p1, %p731_p0 }
   0x9   :  { %739 = shalt.err (!%p736_p2)
}
   0xa   :  { %s740_s22 = scalar_lea.vmem %s36_s14, 256  ;;  %p745_p4 = scmp.lt.s32.totalorder %s36_s14, %s36_s14 }
   0xb   :  { %p741_p3 = scmp.ne.s32.totalorder %s36_s14, %s740_s22  ;;  %p746_p5 = scmp.lt.s32.totalorder %s740_s22, %s740_s22 }
   0xd   :  { %p747_p6 = por %p746_p5, %p745_p4 }
   0xf   :  { %p748_p7 = pnand %p747_p6, %p741_p3 }
  0x11   :  { %751 = shalt.err (!%p748_p7)
}
  0x12   :  { %s873_s23 = smov 64   ;;  %s874_s24 = smov 4  }
  0x13   :  { %41 = dma.hbm_to_vmem [thread:$0]  %s1075_s2, 256, %s36_s14, [#allocation8], %s873_s23, %s873_s23, %s874_s24  }
  0x14   :  { %s875_s27 = smov [#allocation10]   ;;  %s876_s29 = smov [#allocation4]  }
  0x15   :  { %s63_s28 = sshll.u32 %s875_s27, 4  ;;  %s26_s30 = sshll.u32 %s876_s29, 4  ;;  %s64_s28 = int_to_ptr.vmem [resolvable:$true] %s63_s28  ;;  %s27_s30 = int_to_ptr.vmem [resolvable:$true] %s26_s30 }
  0x16   :  { %s752_s13 = scalar_lea.hbm %s1079_s6, 1024 }
  0x17   :  { %p753_p8 = scmp.ne.s32.totalorder %s1079_s6, %s752_s13  ;;  %p756_p9 = scmp.lt.u32.totalorder %s752_s13, %s1079_s6 }
  0x19   :  { %p758_p10 = pnand %p756_p9, %p753_p8 }
  0x1b   :  { %761 = shalt.err (!%p758_p10)
}
  0x1c   :  { %s762_s2 = scalar_lea.vmem %s64_s28, 1024  ;;  %p767_p12 = scmp.lt.s32.totalorder %s64_s28, %s64_s28 }
  0x1d   :  { %p763_p11 = scmp.ne.s32.totalorder %s64_s28, %s762_s2  ;;  %p768_p13 = scmp.lt.s32.totalorder %s762_s2, %s762_s2 }
  0x1f   :  { %p769_p0 = por %p768_p13, %p767_p12 }
  0x21   :  { %p770_p1 = pnand %p769_p0, %p763_p11 }
  0x23   :  { %773 = shalt.err (!%p770_p1)
}
  0x24   :  { %69 = dma.hbm_to_vmem [thread:$0]  %s1079_s6, 1024, %s64_s28, [#allocation11], %s873_s23, %s873_s23, %s874_s24  }
  0x25   :  { %s774_s22 = scalar_lea.hbm %s1074_s1, 128 }
  0x26   :  { %p775_p2 = scmp.ne.s32.totalorder %s1074_s1, %s774_s22  ;;  %p778_p3 = scmp.lt.u32.totalorder %s774_s22, %s1074_s1 }
  0x28   :  { %p780_p4 = pnand %p778_p3, %p775_p2 }
  0x2a   :  { %783 = shalt.err (!%p780_p4)
}
  0x2b   :  { %s784_s11 = scalar_lea.vmem %s27_s30, 128  ;;  %p789_p6 = scmp.lt.s32.totalorder %s27_s30, %s27_s30 }
  0x2c   :  { %p785_p5 = scmp.ne.s32.totalorder %s27_s30, %s784_s11  ;;  %p790_p7 = scmp.lt.s32.totalorder %s784_s11, %s784_s11 }
  0x2e   :  { %p791_p8 = por %p790_p7, %p789_p6 }
  0x30   :  { %p792_p9 = pnand %p791_p8, %p785_p5 }
  0x32   :  { %795 = shalt.err (!%p792_p9)
}
  0x33   :  { %29 = dma.hbm_to_vmem [thread:$0]  %s1074_s1, 128, %s27_s30, [#allocation5]  }
  0x34   :  { %s877_s12 = smov [#allocation9]   ;;  %s593_s17 = sshll.u32 %s1073_s0, 10 }
  0x35   :  { %s49_s13 = sshll.u32 %s877_s12, 4  ;;  %s796_s14 = scalar_lea.hbm %s1077_s4, 1024  ;;  %s50_s13 = int_to_ptr.vmem [resolvable:$true] %s49_s13 }
  0x36   :  { %p797_p10 = scmp.ne.s32.totalorder %s1077_s4, %s796_s14  ;;  %p800_p11 = scmp.lt.u32.totalorder %s796_s14, %s1077_s4 }
  0x38   :  { %p802_p12 = pnand %p800_p11, %p797_p10 }
  0x3a   :  { %805 = shalt.err (!%p802_p12)
}
  0x3b   :  { %s806_s1 = scalar_lea.vmem %s50_s13, 1024  ;;  %p811_p0 = scmp.lt.s32.totalorder %s50_s13, %s50_s13 }
  0x3c   :  { %p807_p13 = scmp.ne.s32.totalorder %s50_s13, %s806_s1  ;;  %p812_p1 = scmp.lt.s32.totalorder %s806_s1, %s806_s1 }
  0x3e   :  { %p813_p2 = por %p812_p1, %p811_p0 }
  0x40   :  { %p814_p3 = pnand %p813_p2, %p807_p13 }
  0x42   :  { %817 = shalt.err (!%p814_p3)
}
  0x43   :  { %55 = dma.hbm_to_vmem [thread:$0]  %s1077_s4, 1024, %s50_s13, [#allocation8], %s873_s23, %s873_s23, %s874_s24  }
  0x44   :  { %s80_s29 = scalar_lea.hbm %s1081_s8, %s593_s17  ;;  %s878_s11 = smov [#allocation12]  }
  0x45   :  { %s81_s6 = sshll.u32 %s878_s11, 4  ;;  %s818_s28 = scalar_lea.hbm %s80_s29, 1024  ;;  %s82_s6 = int_to_ptr.vmem [resolvable:$true] %s81_s6 }
  0x46   :  { %p819_p4 = scmp.ne.s32.totalorder %s80_s29, %s818_s28  ;;  %s820_s16 = scalar_lea.hbm %s1081_s8, 3072 }
  0x47   :  { %p821_p5 = scmp.lt.u32.totalorder %s80_s29, %s1081_s8  ;;  %p822_p6 = scmp.lt.u32.totalorder %s820_s16, %s818_s28 }
  0x48   :  { %p824_p8 = scmp.lt.u32.totalorder %s818_s28, %s80_s29 }
  0x49   :  { %p823_p7 = por %p822_p6, %p821_p5 }
  0x4b   :  { %p825_p9 = por %p824_p8, %p823_p7 }
  0x4d   :  { %p826_p10 = pnand %p825_p9, %p819_p4 }
  0x4f   :  { %829 = shalt.err (!%p826_p10)
}
  0x50   :  { %s830_s4 = scalar_lea.vmem %s82_s6, 1024  ;;  %p835_p12 = scmp.lt.s32.totalorder %s82_s6, %s82_s6 }
  0x51   :  { %p831_p11 = scmp.ne.s32.totalorder %s82_s6, %s830_s4  ;;  %p836_p13 = scmp.lt.s32.totalorder %s830_s4, %s830_s4 }
  0x53   :  { %p837_p0 = por %p836_p13, %p835_p12 }
  0x55   :  { %p838_p1 = pnand %p837_p0, %p831_p11 }
  0x57   :  { %841 = shalt.err (!%p838_p1)
}
  0x58   :  { %87 = dma.hbm_to_vmem [thread:$0]  %s80_s29, 1024, %s82_s6, [#allocation11], %s873_s23, %s873_s23, %s874_s24  }
  0x59   :  { %864 = dma.done.wait [#allocation5], 128  }
  0x5a   :  { %865 = vsyncadd [#allocation5], 4294967168 }
  0x5b   :  { %866 = dma.done.wait [#allocation8], 1280  }
  0x5c   :  { %867 = vsyncadd [#allocation8], 4294966016 }
  0x5d   :  { %868 = dma.done.wait [#allocation11], 2048  }
  0x5e   :  { %869 = vsyncadd [#allocation11], 4294965248  ;;  %v879_v0 = vmov 0.0   ;;  %vm880_vm0 = vmmov 0   ;;  %v702_v1 = vld [vmem:[#allocation7] sm:$0xff]   ;;  %v703_v2 = vld [vmem:[#allocation7 + $0x8] sm:$0xff]   ;;  %v533_v59 = vlaneseq }
  0x5f   :  { %624 = vmatprep.subr.bf16.mxu0 %v879_v0  ;;  %628 = vmatprep.mubr.msk.bf16.mxu0 %vm880_vm0, %v879_v0  ;;  %v121_v3 = vld [vmem:[#allocation4] sm:$0xff]  ;;  %v704_v4 = vld [vmem:[#allocation9] sm:$0xff]   ;;  %vm146_vm1 = vcmask 261120   ;;  %v706_v7 = vld [vmem:[#allocation9 + $0x10] sm:$0xff]   ;;  %p116_p2 = scmp.lt.s32.totalorder %s1073_s0, 2  ;;  %s881_s1 = smov [#allocation13]  }
  0x60   :  { %632 = vmatprep.subr.bf16.mxu1 %v879_v0  ;;  %648 = vmatprep.mubr.msk.bf16.mxu1 %vm880_vm0, %v879_v0  ;;  %v122_v5 = vpack.c.bf16 %v121_v3, %v121_v3  ;;  %v705_v6 = vld [vmem:[#allocation9 + $0x8] sm:$0xff]   ;;  %v707_v8 = vld [vmem:[#allocation9 + $0x18] sm:$0xff]   ;;  %v708_v9 = vld [vmem:[#allocation9 + $0x20] sm:$0xff]   ;;  %v534_v61 = vand.u32 127, %v533_v59  ;;  %s544_s30 = sshll.u32 %s881_s1, 4  ;;  %s545_s30 = int_to_ptr.vmem [resolvable:$true] %s544_s30 }
  0x61   :  { %625 = vmatpush3.bf16.msra.mxu0 %v702_v1  ;;  %633 = vmatpush3.bf16.msra.mxu1 %v704_v4  ;;  %v709_v10 = vld [vmem:[#allocation9 + $0x28] sm:$0xff]   ;;  %v710_v11 = vld [vmem:[#allocation9 + $0x30] sm:$0xff]   ;;  %v711_v12 = vld [vmem:[#allocation9 + $0x38] sm:$0xff]   ;;  %s1085_s0 = smov (!%p116_p2, %s1073_s0), 2  ;;  %p847_p4 = scmp.lt.s32.totalorder %s545_s30, %s545_s30 }
  0x62   :  { %626 = vmatprep.subr.bf16.mxu0 %v879_v0  ;;  %634 = vmatprep.subr.bf16.mxu1 %v879_v0  ;;  %v712_v13 = vld [vmem:[#allocation10] sm:$0xff]   ;;  %v713_v14 = vld [vmem:[#allocation10 + $0x8] sm:$0xff]   ;;  %v714_v15 = vld [vmem:[#allocation10 + $0x10] sm:$0xff]   ;;  %vm535_vm2 = vcmp.lt.s32.totalorder %v534_v61, 8 }
  0x63   :  { %v715_v16 = vld [vmem:[#allocation10 + $0x18] sm:$0xff]   ;;  %v716_v17 = vld [vmem:[#allocation10 + $0x20] sm:$0xff]   ;;  %v717_v18 = vld [vmem:[#allocation10 + $0x28] sm:$0xff]  }
  0x64   :  { %v562_v19 = vld [vmem:[%s1076_s3] ss:$0 sm:$0xff]  ;;  %v718_v27 = vld [vmem:[#allocation10 + $0x30] sm:$0xff]   ;;  %v719_v28 = vld [vmem:[#allocation10 + $0x38] sm:$0xff]  }
  0x65   :  { %627 = vmatpush3.bf16.msra.mxu0 %v703_v2  ;;  %635 = vmatpush3.bf16.msra.mxu1 %v705_v6  ;;  %v720_v29 = vld [vmem:[#allocation12] sm:$0xff]   ;;  %v721_v30 = vld [vmem:[#allocation12 + $0x8] sm:$0xff]   ;;  %v722_v31 = vld [vmem:[#allocation12 + $0x10] sm:$0xff]  }
  0x66   :  { %652 = vmatprep.subr.bf16.mxu0 %v879_v0  ;;  %636 = vmatprep.subr.bf16.mxu1 %v879_v0  ;;  %v723_v32 = vld [vmem:[#allocation12 + $0x18] sm:$0xff]   ;;  %v724_v33 = vld [vmem:[#allocation12 + $0x20] sm:$0xff]   ;;  %v725_v34 = vld [vmem:[#allocation12 + $0x28] sm:$0xff]  }
  0x67   :  { %v566_v35 = vld [vmem:[%s1078_s5] ss:$0 sm:$0xff]  ;;  %v726_v43 = vld [vmem:[#allocation12 + $0x30] sm:$0xff]   ;;  %v727_v44 = vld [vmem:[#allocation12 + $0x38] sm:$0xff]  }
  0x68   :  { %629 = vmatmul.mubr.msk.bf16.vlgmr.msra.gmra.mrb[0].mxu0 %vm146_vm1, %v122_v5  ;;  %v575_v45 = vld [vmem:[%s1080_s7] ss:$0 sm:$0xff]  ;;  %s118_s7 = scalar_lea.vmem %s1082_s9, %s1085_s0  ;;  %s842_s0 = scalar_lea.vmem %s545_s30, 128 }
  0x69   :  { %668 = vmatprep.mubr.msk.bf16.mxu0 %vm880_vm0, %v879_v0  ;;  %637 = vmatpush3.bf16.msra.mxu1 %v706_v7  ;;  %v584_v53 = vld [vmem:[%s118_s7] ss:$0 sm:$0xff]  ;;  %p843_p3 = scmp.ne.s32.totalorder %s545_s30, %s842_s0  ;;  %p848_p5 = scmp.lt.s32.totalorder %s842_s0, %s842_s0 }
  0x6a   :  { %638 = vmatprep.subr.bf16.mxu1 %v879_v0  ;;  %653 = vmatpush3.bf16.msra.mxu0 %v712_v13 }
  0x6b   :  { %654 = vmatprep.subr.bf16.mxu0 %v879_v0  ;;  %p849_p6 = por %p848_p5, %p847_p4 }
  0x6d   :  { %639 = vmatpush3.bf16.msra.mxu1 %v707_v8  ;;  %p850_p7 = pnand %p849_p6, %p843_p3 }
  0x6e   :  { %640 = vmatprep.subr.bf16.mxu1 %v879_v0  ;;  %655 = vmatpush3.bf16.msra.mxu0 %v713_v14 }
  0x6f   :  { %656 = vmatprep.subr.bf16.mxu0 %v879_v0 }
  0x71   :  { %641 = vmatpush3.bf16.msra.mxu1 %v708_v9 }
  0x72   :  { %642 = vmatprep.subr.bf16.mxu1 %v879_v0  ;;  %657 = vmatpush3.bf16.msra.mxu0 %v714_v15 }
  0x73   :  { %658 = vmatprep.subr.bf16.mxu0 %v879_v0 }
  0x75   :  { %643 = vmatpush3.bf16.msra.mxu1 %v709_v10 }
  0x76   :  { %644 = vmatprep.subr.bf16.mxu1 %v879_v0  ;;  %659 = vmatpush3.bf16.msra.mxu0 %v715_v16 }
  0x77   :  { %660 = vmatprep.subr.bf16.mxu0 %v879_v0 }
  0x79   :  { %645 = vmatpush3.bf16.msra.mxu1 %v710_v11 }
  0x7a   :  { %646 = vmatprep.subr.bf16.mxu1 %v879_v0  ;;  %661 = vmatpush3.bf16.msra.mxu0 %v716_v17 }
  0x7b   :  { %662 = vmatprep.subr.bf16.mxu0 %v879_v0 }
  0x7d   :  { %647 = vmatpush3.bf16.msra.mxu1 %v711_v12 }
  0x7e   :  { %672 = vmatprep.subr.bf16.mxu1 %v879_v0  ;;  %663 = vmatpush3.bf16.msra.mxu0 %v717_v18 }
  0x7f   :  { %664 = vmatprep.subr.bf16.mxu0 %v879_v0 }
  0x82   :  { %665 = vmatpush3.bf16.msra.mxu0 %v718_v27 }
  0x83   :  { %666 = vmatprep.subr.bf16.mxu0 %v879_v0 }
  0x86   :  { %667 = vmatpush3.bf16.msra.mxu0 %v719_v28 }
 0x13b   :  { %v184_v20 = vpop.f32.mrb[0].mxu0 }
 0x13c   :  { %v185_v21 = vadd.f32 %v562_v19, %v184_v20  ;;  %v630_v22 = vpop.f32.mrb[1].mxu0 }
 0x13d   :  { %v187_v23 = vpop.f32.mrb[2].mxu0 }
 0x13e   :  { %v190_v24 = vmax.f32 %v185_v21, 0.0  ;;  %v631_v25 = vpop.f32.mrb[3].mxu0 }
 0x140   :  { %v191_v26 = vpack.c.bf16 %v190_v24, %v190_v24 }
 0x142   :  { %649 = vmatmul.mubr.bf16.vlgmr.msra.gmra.mrb[0].mxu1 %v191_v26 }
 0x143   :  { %688 = vmatprep.mubr.msk.bf16.mxu1 %vm880_vm0, %v879_v0  ;;  %673 = vmatpush3.bf16.msra.mxu1 %v720_v29 }
 0x144   :  { %674 = vmatprep.subr.bf16.mxu1 %v879_v0 }
 0x147   :  { %675 = vmatpush3.bf16.msra.mxu1 %v721_v30 }
 0x148   :  { %676 = vmatprep.subr.bf16.mxu1 %v879_v0 }
 0x14b   :  { %677 = vmatpush3.bf16.msra.mxu1 %v722_v31 }
 0x14c   :  { %678 = vmatprep.subr.bf16.mxu1 %v879_v0 }
 0x14f   :  { %679 = vmatpush3.bf16.msra.mxu1 %v723_v32 }
 0x150   :  { %680 = vmatprep.subr.bf16.mxu1 %v879_v0 }
 0x153   :  { %681 = vmatpush3.bf16.msra.mxu1 %v724_v33 }
 0x154   :  { %682 = vmatprep.subr.bf16.mxu1 %v879_v0 }
 0x157   :  { %683 = vmatpush3.bf16.msra.mxu1 %v725_v34 }
 0x158   :  { %684 = vmatprep.subr.bf16.mxu1 %v879_v0 }
 0x15b   :  { %685 = vmatpush3.bf16.msra.mxu1 %v726_v43 }
 0x15c   :  { %686 = vmatprep.subr.bf16.mxu1 %v879_v0 }
 0x15f   :  { %687 = vmatpush3.bf16.msra.mxu1 %v727_v44 }
 0x215   :  { %v297_v36 = vpop.f32.mrb[0].mxu1 }
 0x216   :  { %v298_v37 = vadd.f32 %v566_v35, %v297_v36  ;;  %v650_v38 = vpop.f32.mrb[1].mxu1 }
 0x217   :  { %v300_v39 = vpop.f32.mrb[2].mxu1 }
 0x218   :  { %v303_v40 = vmax.f32 %v298_v37, 0.0  ;;  %v651_v41 = vpop.f32.mrb[3].mxu1 }
 0x21a   :  { %v304_v42 = vpack.c.bf16 %v303_v40, %v303_v40 }
 0x21c   :  { %669 = vmatmul.mubr.bf16.vlgmr.msra.gmra.mrb[4].mxu0 %v304_v42 }
 0x2ef   :  { %v410_v46 = vpop.f32.mrb[4].mxu0 }
 0x2f0   :  { %v411_v47 = vadd.f32 %v575_v45, %v410_v46  ;;  %v670_v48 = vpop.f32.mrb[5].mxu0 }
 0x2f1   :  { %v413_v49 = vpop.f32.mrb[6].mxu0 }
 0x2f2   :  { %v416_v50 = vmax.f32 %v411_v47, 0.0  ;;  %v671_v51 = vpop.f32.mrb[7].mxu0 }
 0x2f4   :  { %v417_v52 = vpack.c.bf16 %v416_v50, %v416_v50 }
 0x2f6   :  { %689 = vmatmul.mubr.bf16.vlgmr.msra.gmra.mrb[4].mxu1 %v417_v52 }
 0x3c9   :  { %v523_v54 = vpop.f32.mrb[4].mxu1 }
 0x3ca   :  { %v524_v55 = vadd.f32 %v584_v53, %v523_v54  ;;  %v690_v56 = vpop.f32.mrb[5].mxu1 }
 0x3cb   :  { %v526_v57 = vpop.f32.mrb[6].mxu1 }
 0x3cc   :  { %728 = vtanh.f32 %v524_v55  ;;  %v691_v58 = vpop.f32.mrb[7].mxu1 }
 0x3d6   :  { %v729_v60 = vpop.eup %728 }
 0x3d7   :  { %v530_v62 = vadd.f32 1.0, %v729_v60 }
 0x3d9   :  { %v531_v63 = vmul.f32 3.5, %v530_v62 }
 0x3db   :  { %v532_v0 = vadd.f32 -5.0, %v531_v63 }
 0x3dd   :  { %v536_v1 = vsel %vm535_vm2, %v524_v55, %v532_v0 }
 0x3de   :  { %537 = vst [vmem:[#allocation13] sm:$0xff] %v536_v1 }
 0x3df   :  { %853 = shalt.err (!%p850_p7)
}
 0x3e0   :  { %s854_s26 = scalar_lea.hbm %s1083_s10, 128 }
 0x3e1   :  { %p855_p8 = scmp.ne.s32.totalorder %s1083_s10, %s854_s26  ;;  %p858_p9 = scmp.lt.u32.totalorder %s854_s26, %s1083_s10 }
 0x3e3   :  { %p860_p10 = pnand %p858_p9, %p855_p8 }
 0x3e5   :  { %863 = shalt.err (!%p860_p10)
}
 0x3e6   :  { %547 = dma.vmem_to_hbm [thread:$0]  %s545_s30, 128, %s1083_s10, [#allocation6]  }
 0x3e7   :  { %870 = dma.done.wait [#allocation6], 128  }
 0x3e8   :  { %871 = vsyncadd [#allocation6], 4294967168 }
 0x3e9   :  { %551 = vsyncpa [#allocation5], 1 }
 0x3ea   :  { %552 = vsyncpa [#allocation8], 1 }
 0x3eb   :  { %553 = vsyncpa [#allocation11], 1 }
 0x3ec   :  { %554 = vsyncpa [#allocation6], 1 }

</bundles_post_ra>
